<compile_context>
chip_gen: v7x
topology: tpu7x:2x2x1
jax: 0.10.0
libtpu: 0.0.40
codegen_flags: <defaults>
</compile_context>

<pallas_src>
import jax
import jax.numpy as jnp
from jax.experimental import pallas as pl
from jax.experimental.pallas import tpu as pltpu


def _dummy_encoder_kernel(x_hbm_ref, out_ref):
    # x stays in HBM and is never read (the reference module ignores it).
    out_ref[...] = jnp.zeros_like(out_ref)


def dummy_encoder(x, latent_dim: int):
    """x: (B, C, H, W) any float dtype. Returns (means, logvars), both (B, latent_dim) f32."""
    batch = x.shape[0]
    width = 2 * latent_dim  # fused [means | logvars] slab, lane-denser than latent_dim alone

    # Tile the batch axis; full-extent tile for small batches, 1024-row
    # (sublane-aligned, multiple of 8) tiles once batch grows.
    tb = batch if batch <= 1024 else 1024
    grid = (pl.cdiv(batch, tb),)

    fused = pl.pallas_call(
        _dummy_encoder_kernel,
        out_shape=jax.ShapeDtypeStruct((batch, width), jnp.float32),
        grid=grid,
        in_specs=[pl.BlockSpec(memory_space=pl.ANY)],  # raw HBM ref, no DMA of x
        out_specs=pl.BlockSpec((tb, width), lambda i: (i, 0)),
        compiler_params=pltpu.CompilerParams(
            dimension_semantics=("parallel",)
        ),
    )(x)

    means = fused[:, :latent_dim]
    logvars = fused[:, latent_dim:]
    return means, logvars


if __name__ == "__main__":
    key = jax.random.PRNGKey(0)
    batch, channels, spatial = 2, 4, 16
    latent_dim = 32

    x = jax.random.normal(key, (batch, channels, spatial, spatial), dtype=jnp.float32)

    means, logvars = dummy_encoder(x, latent_dim)
    jax.block_until_ready((means, logvars))

    assert means.shape == (batch, latent_dim)
    assert logvars.shape == (batch, latent_dim)
    assert means.dtype == jnp.float32 and logvars.dtype == jnp.float32
    assert bool(jnp.all(means == 0.0)) and bool(jnp.all(logvars == 0.0))

    print("KERNEL_OK")
</pallas_src>

<mosaic_0001>
module attributes {stable_mosaic.version = 11 : i64} {
  func.func @_dummy_encoder_kernel(%arg0: i32, %arg1: memref<2x4x16x16xf32, #tpu.memory_space<any>>, %arg2: memref<2x64xf32, #tpu.memory_space<vmem>>) attributes {dimension_semantics = [#tpu.dimension_semantics<parallel>], iteration_bounds = array<i64: 1>, scalar_prefetch = 0 : i64, scratch_operands = 0 : i64, tpu.core_type = #tpu.core_type<tc>, window_params = [{}, {transform_indices = @transform_1, window_bounds = array<i64: 2, 64>}]} {
    %cst = arith.constant 0.000000e+00 : f32
    %0 = vector.broadcast %cst : f32 to vector<2x64xf32>
    %c0 = arith.constant 0 : index
    %c0_0 = arith.constant 0 : index
    %1 = vector.load %arg2[%c0, %c0_0] : memref<2x64xf32, #tpu.memory_space<vmem>>, vector<2x64xf32>
    tpu.vector_store %arg2[%c0, %c0_0], %0 {strides = array<i32>} : memref<2x64xf32, #tpu.memory_space<vmem>>, vector<2x64xf32>,
    return
  }
  func.func @transform_1(%arg0: i32) -> (i32, i32) {
    %c0_i32 = arith.constant 0 : i32
    %c0_i32_0 = arith.constant 0 : i32
    return %arg0, %c0_i32 : i32, i32
  }
}

</mosaic_0001>

<bundles_post_ra>
// kernel: tpu_custom_call.1
= control target key start
LH: loop header
LB: loop body
LE: loop exit
PB: predicated region body
PF: predicated region fallthrough
CT: control target
= control target key end

     0   :  { %vm7_vm0 = vcmask 517120   ;;  %s73_s0 = inlined_call_operand.hbm [shape: f32[2,4,16,16], index: 0, kind: input, shape index: {}]   ;;  %s74_s1 = inlined_call_operand.hbm [shape: f32[2,64], index: 1, kind: output, shape index: {}]  }
   0x1   :  { %6 = vsyncpa [#allocation3], 0  ;;  %v49_v0 = vmov 0.0   ;;  %s50_s6 = smov [#allocation2]  }
   0x2   :  { %8 = vst.msk [vmem:[#allocation2] sm:$0x3] %vm7_vm0, %v49_v0  ;;  %s15_s7 = sshll.u32 %s50_s6, 4  ;;  %s16_s7 = int_to_ptr.vmem [resolvable:$true] %s15_s7 }
   0x3   :  { %s25_s8 = scalar_lea.vmem %s16_s7, 32  ;;  %p30_p1 = scmp.lt.s32.totalorder %s16_s7, %s16_s7 }
   0x4   :  { %p26_p0 = scmp.ne.s32.totalorder %s16_s7, %s25_s8  ;;  %p31_p2 = scmp.lt.s32.totalorder %s25_s8, %s25_s8 }
   0x6   :  { %p32_p3 = por %p31_p2, %p30_p1 }
   0x8   :  { %p33_p4 = pnand %p32_p3, %p26_p0 }
   0xa   :  { %36 = shalt.err (!%p33_p4)
}
   0xb   :  { %s37_s0 = scalar_lea.hbm %s74_s1, 32 }
   0xc   :  { %p38_p5 = scmp.ne.s32.totalorder %s74_s1, %s37_s0  ;;  %p41_p6 = scmp.lt.u32.totalorder %s37_s0, %s74_s1 }
   0xe   :  { %p43_p7 = pnand %p41_p6, %p38_p5 }
  0x10   :  { %46 = shalt.err (!%p43_p7)
}
  0x11   :  { %18 = dma.vmem_to_hbm [thread:$0]  %s16_s7, 32, %s74_s1, [#allocation3]  }
  0x12   :  { %47 = dma.done.wait [#allocation3], 32  }
  0x13   :  { %48 = vsyncadd [#allocation3], 4294967264 }
  0x14   :  { %22 = vsyncpa [#allocation3], 1 }

</bundles_post_ra>
